<compile_context>
chip_gen: v5e
topology: v5e:2x2
jax: 0.10.0
libtpu: 0.0.40
codegen_flags: <defaults>
</compile_context>

<pallas_src>
import functools

import jax
import jax.numpy as jnp
from jax.experimental import pallas as pl
from jax.experimental.pallas import tpu as pltpu


def _round_up(x, m):
    return -(-x // m) * m


def _default_tile_b(B):
    """Pick the batch tile: big enough to amortize per-step overhead and fill
    the MXU M dimension, but keep >=2 grid steps for large batches so v7x's
    two TensorCores both get work via the 'parallel' grid axis."""
    if B >= 1024:
        return 512                       # multiple of 128 (v5e MXU) and 256 (v6e/v7x)
    if B > 256:
        return 256
    return min(256, _round_up(B, 32))    # tiny batch: one tile covering the whole batch


def _make_kernel(num_linear):
    """Full MLP hot path for one batch tile.

    Ref order: in, hint, w1a, w1b, b1, [w_i, b_i for i = 2..num_linear], out.
    All matmuls accumulate in f32 on the MXU; tanh/sigmoid run in f32; hidden
    activations are cast back to the weight dtype only at jnp.dot boundaries.
    """

    def kernel(*refs):
        in_ref, hint_ref = refs[0], refs[1]
        wb = refs[2:-1]                  # w1a, w1b, b1, w2, b2, ..., wn, bn
        o_ref = refs[-1]

        # First linear layer, split over the concatenated feature axis
        # (avoids materializing concat(inputs, hints) in HBM).
        z = (jnp.dot(in_ref[...], wb[0][...], preferred_element_type=jnp.float32)
             + jnp.dot(hint_ref[...], wb[1][...], preferred_element_type=jnp.float32)
             + wb[2][...])

        idx = 3
        for _ in range(num_linear - 1):
            h = jnp.tanh(z).astype(wb[idx].dtype)        # hidden Tanh (f32 math)
            z = (jnp.dot(h, wb[idx][...], preferred_element_type=jnp.float32)
                 + wb[idx + 1][...])
            idx += 2

        # TODO(synk): Dout < 128 lanes -> masked vst; a lane-dense output repack
        # is only worth it if profiling shows the store slot is the bottleneck.
        o_ref[...] = jax.nn.sigmoid(z).astype(o_ref.dtype)

    return kernel


def _const_spec(shape):
    """BlockSpec for a grid-invariant operand: whole array, single-buffered."""
    index_map = lambda i: tuple(0 for _ in shape)
    try:
        return pl.BlockSpec(shape, index_map, pipeline_mode=pl.Buffered(1))
    except (TypeError, AttributeError):   # fallback for jax without pipeline_mode
        return pl.BlockSpec(shape, index_map)


@functools.partial(jax.jit, static_argnames=("tile_b", "compute_dtype"))
def discriminator_forward(inputs, hints, params, *, tile_b=None,
                          compute_dtype=jnp.bfloat16):
    """inputs: (B, size), hints: (B, size) -> (B, size) f32 probabilities."""
    B, size = inputs.shape
    assert hints.shape == (B, size)
    num_linear = len(params) // 2
    w1 = params[0]
    assert w1.shape[0] == 2 * size, "first layer expects concat(inputs, hints)"
    Dout = params[-2].shape[1]

    if tile_b is None:
        tile_b = _default_tile_b(B)
    tile_b = _round_up(int(tile_b), 32)        # sublane-safe for f32/bf16/int8

    padded_B = _round_up(B, tile_b)            # no divisibility assert: pad + slice
    grid = (padded_B // tile_b,)

    # Cast MXU operands to the compute dtype; biases (added to the f32
    # accumulator) stay f32.
    x_in = inputs.astype(compute_dtype)
    x_hint = hints.astype(compute_dtype)
    if padded_B != B:
        pad = padded_B - B
        x_in = jnp.pad(x_in, ((0, pad), (0, 0)))
        x_hint = jnp.pad(x_hint, ((0, pad), (0, 0)))

    w1a = w1[:size].astype(compute_dtype)      # inputs' half of the first layer
    w1b = w1[size:].astype(compute_dtype)      # hints' half of the first layer
    flat_params = [w1a, w1b, params[1].reshape(1, -1).astype(jnp.float32)]
    for li in range(1, num_linear):
        flat_params.append(params[2 * li].astype(compute_dtype))
        flat_params.append(params[2 * li + 1].reshape(1, -1).astype(jnp.float32))

    batch_map = lambda i: (i, 0)
    in_specs = [pl.BlockSpec((tile_b, size), batch_map),
                pl.BlockSpec((tile_b, size), batch_map)]
    in_specs += [_const_spec(p.shape) for p in flat_params]

    out = pl.pallas_call(
        _make_kernel(num_linear),
        out_shape=jax.ShapeDtypeStruct((padded_B, Dout), jnp.float32),
        grid_spec=pltpu.PrefetchScalarGridSpec(
            num_scalar_prefetch=0,
            grid=grid,
            in_specs=in_specs,
            out_specs=pl.BlockSpec((tile_b, Dout), batch_map),
        ),
        compiler_params=pltpu.CompilerParams(
            dimension_semantics=("parallel",)),
    )(x_in, x_hint, *flat_params)

    return out[:B]


def init_params(key, size, hidden_sizes):
    """Deterministic synthetic parameters matching nn.Linear shapes.

    Discriminator(size=int): previous_layer_size = 2*size, output_size = size.
    Returned weights are (in, out) (transpose of PyTorch's (out, in))."""
    dims = [2 * size] + list(hidden_sizes) + [size]
    params = []
    keys = jax.random.split(key, 2 * (len(dims) - 1))
    for li in range(len(dims) - 1):
        fan_in, fan_out = dims[li], dims[li + 1]
        bound = 1.0 / jnp.sqrt(fan_in)
        w = jax.random.uniform(keys[2 * li], (fan_in, fan_out),
                               minval=-bound, maxval=bound, dtype=jnp.float32)
        b = jax.random.uniform(keys[2 * li + 1], (1, fan_out),
                               minval=-bound, maxval=bound, dtype=jnp.float32)
        params.extend([w, b])
    return tuple(params)


def reference_forward(inputs, hints, params, compute_dtype=jnp.bfloat16):
    """Plain-JAX reference mirroring the PyTorch module, with the same dtype
    policy as the kernel (compute_dtype matmul operands, f32 accumulation)."""
    num_linear = len(params) // 2
    x = jnp.concatenate([inputs, hints], axis=1).astype(compute_dtype)
    z = None
    for li in range(num_linear):
        w = params[2 * li].astype(compute_dtype)
        b = params[2 * li + 1].reshape(1, -1).astype(jnp.float32)
        h = x if li == 0 else jnp.tanh(z).astype(compute_dtype)
        z = jnp.dot(h, w, preferred_element_type=jnp.float32) + b
    return jax.nn.sigmoid(z)


if __name__ == "__main__":
    key = jax.random.PRNGKey(0)
    k_in, k_hint, k_param = jax.random.split(key, 3)

    size = 16                  # int `size` -> input 2*size, output size
    hidden_sizes = [32, 32]    # two hidden Tanh layers
    params = init_params(k_param, size, hidden_sizes)

    # Small batch that is NOT a multiple of the tile: exercises the padding path.
    batch = 10
    inputs = jax.random.uniform(k_in, (batch, size), dtype=jnp.float32)
    # hints in GAIN are {0,1} masks (partially revealed); any values work here.
    hints = (jax.random.uniform(k_hint, (batch, size)) > 0.5).astype(jnp.float32)

    # Strict check: f32 end-to-end vs f32 reference.
    out_f32 = discriminator_forward(inputs, hints, params,
                                    compute_dtype=jnp.float32)
    out_f32 = jax.block_until_ready(out_f32)
    ref_f32 = reference_forward(inputs, hints, params, compute_dtype=jnp.float32)
    assert out_f32.shape == (batch, size)
    assert jnp.allclose(out_f32, ref_f32, atol=1e-5, rtol=1e-5), "f32 mismatch"

    # Default path: bf16 MXU operands, f32 accumulation; matched reference.
    out_bf16 = jax.block_until_ready(discriminator_forward(inputs, hints, params))
    ref_bf16 = reference_forward(inputs, hints, params)
    assert jnp.allclose(out_bf16, ref_bf16, atol=2e-3, rtol=0), "bf16 mismatch"

    # Larger (still tiny) batch: multi-step grid (parallel axis -> both v7x TCs)
    # plus padding of the last tile.
    batch2 = 384
    inputs2 = jax.random.uniform(k_in, (batch2, size), dtype=jnp.float32)
    hints2 = (jax.random.uniform(k_hint, (batch2, size)) > 0.5).astype(jnp.float32)
    out2 = jax.block_until_ready(discriminator_forward(inputs2, hints2, params))
    ref2 = reference_forward(inputs2, hints2, params)
    assert out2.shape == (batch2, size)
    assert jnp.allclose(out2, ref2, atol=2e-3, rtol=0), "batched bf16 mismatch"

    print("KERNEL_OK")
</pallas_src>

<mosaic_0001>
module attributes {stable_mosaic.version = 11 : i64} {
  func.func @kernel(%arg0: i32, %arg1: memref<32x16xf32, #tpu.memory_space<vmem>>, %arg2: memref<32x16xf32, #tpu.memory_space<vmem>>, %arg3: memref<16x32xf32, #tpu.memory_space<vmem>>, %arg4: memref<16x32xf32, #tpu.memory_space<vmem>>, %arg5: memref<1x32xf32, #tpu.memory_space<vmem>>, %arg6: memref<32x32xf32, #tpu.memory_space<vmem>>, %arg7: memref<1x32xf32, #tpu.memory_space<vmem>>, %arg8: memref<32x16xf32, #tpu.memory_space<vmem>>, %arg9: memref<1x16xf32, #tpu.memory_space<vmem>>, %arg10: memref<32x16xf32, #tpu.memory_space<vmem>>) attributes {dimension_semantics = [#tpu.dimension_semantics<parallel>], iteration_bounds = array<i64: 1>, scalar_prefetch = 0 : i64, scratch_operands = 0 : i64, tpu.core_type = #tpu.core_type<tc>, window_params = [{transform_indices = @transform_0, window_bounds = array<i64: 32, 16>}, {transform_indices = @transform_1, window_bounds = array<i64: 32, 16>}, {pipeline_mode = #tpu.pipeline_mode<synchronous>, transform_indices = @transform_2, window_bounds = array<i64: 16, 32>}, {pipeline_mode = #tpu.pipeline_mode<synchronous>, transform_indices = @transform_3, window_bounds = array<i64: 16, 32>}, {pipeline_mode = #tpu.pipeline_mode<synchronous>, transform_indices = @transform_4, window_bounds = array<i64: 1, 32>}, {pipeline_mode = #tpu.pipeline_mode<synchronous>, transform_indices = @transform_5, window_bounds = array<i64: 32, 32>}, {pipeline_mode = #tpu.pipeline_mode<synchronous>, transform_indices = @transform_6, window_bounds = array<i64: 1, 32>}, {pipeline_mode = #tpu.pipeline_mode<synchronous>, transform_indices = @transform_7, window_bounds = array<i64: 32, 16>}, {pipeline_mode = #tpu.pipeline_mode<synchronous>, transform_indices = @transform_8, window_bounds = array<i64: 1, 16>}, {transform_indices = @transform_9, window_bounds = array<i64: 32, 16>}]} {
    %c0 = arith.constant 0 : index
    %c0_0 = arith.constant 0 : index
    %0 = vector.load %arg1[%c0, %c0_0] : memref<32x16xf32, #tpu.memory_space<vmem>>, vector<32x16xf32>
    %c0_1 = arith.constant 0 : index
    %c0_2 = arith.constant 0 : index
    %1 = vector.load %arg3[%c0_1, %c0_2] : memref<16x32xf32, #tpu.memory_space<vmem>>, vector<16x32xf32>
    %cst = arith.constant dense<0.000000e+00> : vector<32x32xf32>
    %2 = tpu.matmul %0, %1, %cst {dimension_numbers = #tpu.dot_dimension_numbers<[1], [0], [0], [1], [0, 0, 1, 1], [], []>} : vector<32x16xf32>, vector<16x32xf32>, vector<32x32xf32> -> vector<32x32xf32>
    %c0_3 = arith.constant 0 : index
    %c0_4 = arith.constant 0 : index
    %3 = vector.load %arg2[%c0_3, %c0_4] : memref<32x16xf32, #tpu.memory_space<vmem>>, vector<32x16xf32>
    %c0_5 = arith.constant 0 : index
    %c0_6 = arith.constant 0 : index
    %4 = vector.load %arg4[%c0_5, %c0_6] : memref<16x32xf32, #tpu.memory_space<vmem>>, vector<16x32xf32>
    %cst_7 = arith.constant dense<0.000000e+00> : vector<32x32xf32>
    %5 = tpu.matmul %3, %4, %cst_7 {dimension_numbers = #tpu.dot_dimension_numbers<[1], [0], [0], [1], [0, 0, 1, 1], [], []>} : vector<32x16xf32>, vector<16x32xf32>, vector<32x32xf32> -> vector<32x32xf32>
    %6 = arith.addf %2, %5 : vector<32x32xf32>
    %c0_8 = arith.constant 0 : index
    %c0_9 = arith.constant 0 : index
    %7 = vector.load %arg5[%c0_8, %c0_9] : memref<1x32xf32, #tpu.memory_space<vmem>>, vector<1x32xf32>
    %8 = vector.broadcast %7 : vector<1x32xf32> to vector<32x32xf32>
    %9 = arith.addf %6, %8 : vector<32x32xf32>
    %10 = math.tanh %9 : vector<32x32xf32>
    %c0_10 = arith.constant 0 : index
    %c0_11 = arith.constant 0 : index
    %11 = vector.load %arg6[%c0_10, %c0_11] : memref<32x32xf32, #tpu.memory_space<vmem>>, vector<32x32xf32>
    %cst_12 = arith.constant dense<0.000000e+00> : vector<32x32xf32>
    %12 = tpu.matmul %10, %11, %cst_12 {dimension_numbers = #tpu.dot_dimension_numbers<[1], [0], [0], [1], [0, 0, 1, 1], [], []>} : vector<32x32xf32>, vector<32x32xf32>, vector<32x32xf32> -> vector<32x32xf32>
    %c0_13 = arith.constant 0 : index
    %c0_14 = arith.constant 0 : index
    %13 = vector.load %arg7[%c0_13, %c0_14] : memref<1x32xf32, #tpu.memory_space<vmem>>, vector<1x32xf32>
    %14 = vector.broadcast %13 : vector<1x32xf32> to vector<32x32xf32>
    %15 = arith.addf %12, %14 : vector<32x32xf32>
    %16 = math.tanh %15 : vector<32x32xf32>
    %c0_15 = arith.constant 0 : index
    %c0_16 = arith.constant 0 : index
    %17 = vector.load %arg8[%c0_15, %c0_16] : memref<32x16xf32, #tpu.memory_space<vmem>>, vector<32x16xf32>
    %cst_17 = arith.constant dense<0.000000e+00> : vector<32x16xf32>
    %18 = tpu.matmul %16, %17, %cst_17 {dimension_numbers = #tpu.dot_dimension_numbers<[1], [0], [0], [1], [0, 0, 1, 1], [], []>} : vector<32x32xf32>, vector<32x16xf32>, vector<32x16xf32> -> vector<32x16xf32>
    %c0_18 = arith.constant 0 : index
    %c0_19 = arith.constant 0 : index
    %19 = vector.load %arg9[%c0_18, %c0_19] : memref<1x16xf32, #tpu.memory_space<vmem>>, vector<1x16xf32>
    %20 = vector.broadcast %19 : vector<1x16xf32> to vector<32x16xf32>
    %21 = arith.addf %18, %20 : vector<32x16xf32>
    %22 = arith.negf %21 : vector<32x16xf32>
    %23 = math.exp %22 : vector<32x16xf32>
    %cst_20 = arith.constant 1.000000e+00 : f32
    %24 = vector.broadcast %cst_20 : f32 to vector<32x16xf32>
    %25 = arith.addf %24, %23 : vector<32x16xf32>
    %26 = arith.divf %24, %25 : vector<32x16xf32>
    %c0_21 = arith.constant 0 : index
    %c0_22 = arith.constant 0 : index
    %27 = vector.load %arg10[%c0_21, %c0_22] : memref<32x16xf32, #tpu.memory_space<vmem>>, vector<32x16xf32>
    tpu.vector_store %arg10[%c0_21, %c0_22], %26 {strides = array<i32>} : memref<32x16xf32, #tpu.memory_space<vmem>>, vector<32x16xf32>,
    return
  }
  func.func @transform_0(%arg0: i32) -> (i32, i32) {
    %c0_i32 = arith.constant 0 : i32
    %c0_i32_0 = arith.constant 0 : i32
    return %arg0, %c0_i32 : i32, i32
  }
  func.func @transform_1(%arg0: i32) -> (i32, i32) {
    %c0_i32 = arith.constant 0 : i32
    %c0_i32_0 = arith.constant 0 : i32
    return %arg0, %c0_i32 : i32, i32
  }
  func.func @transform_2(%arg0: i32) -> (i32, i32) {
    %c0_i32 = arith.constant 0 : i32
    %c0_i32_0 = arith.constant 0 : i32
    %c0_i32_1 = arith.constant 0 : i32
    return %c0_i32, %c0_i32_0 : i32, i32
  }
  func.func @transform_3(%arg0: i32) -> (i32, i32) {
    %c0_i32 = arith.constant 0 : i32
    %c0_i32_0 = arith.constant 0 : i32
    %c0_i32_1 = arith.constant 0 : i32
    return %c0_i32, %c0_i32_0 : i32, i32
  }
  func.func @transform_4(%arg0: i32) -> (i32, i32) {
    %c0_i32 = arith.constant 0 : i32
    %c0_i32_0 = arith.constant 0 : i32
    %c0_i32_1 = arith.constant 0 : i32
    return %c0_i32, %c0_i32_0 : i32, i32
  }
  func.func @transform_5(%arg0: i32) -> (i32, i32) {
    %c0_i32 = arith.constant 0 : i32
    %c0_i32_0 = arith.constant 0 : i32
    %c0_i32_1 = arith.constant 0 : i32
    return %c0_i32, %c0_i32_0 : i32, i32
  }
  func.func @transform_6(%arg0: i32) -> (i32, i32) {
    %c0_i32 = arith.constant 0 : i32
    %c0_i32_0 = arith.constant 0 : i32
    %c0_i32_1 = arith.constant 0 : i32
    return %c0_i32, %c0_i32_0 : i32, i32
  }
  func.func @transform_7(%arg0: i32) -> (i32, i32) {
    %c0_i32 = arith.constant 0 : i32
    %c0_i32_0 = arith.constant 0 : i32
    %c0_i32_1 = arith.constant 0 : i32
    return %c0_i32, %c0_i32_0 : i32, i32
  }
  func.func @transform_8(%arg0: i32) -> (i32, i32) {
    %c0_i32 = arith.constant 0 : i32
    %c0_i32_0 = arith.constant 0 : i32
    %c0_i32_1 = arith.constant 0 : i32
    return %c0_i32, %c0_i32_0 : i32, i32
  }
  func.func @transform_9(%arg0: i32) -> (i32, i32) {
    %c0_i32 = arith.constant 0 : i32
    %c0_i32_0 = arith.constant 0 : i32
    return %arg0, %c0_i32 : i32, i32
  }
}

</mosaic_0001>

<bundles_post_ra>
// kernel: discriminator_forward.1
= control target key start
LH: loop header
LB: loop body
LE: loop exit
PB: predicated region body
PF: predicated region fallthrough
CT: control target
= control target key end

     0   :  { %vm44_vm0 = vcmask 130048   ;;  %vm147_vm1 = vcmask 261120   ;;  %s532_s3 = inlined_call_operand.vmem [shape: f32[16,32], index: 3, kind: input, shape index: {}]   ;;  %s533_s2 = inlined_call_operand.vmem [shape: f32[16,32], index: 2, kind: input, shape index: {}]   ;;  %s534_s1 = inlined_call_operand.vmem [shape: f32[32,16], index: 1, kind: input, shape index: {}]   ;;  %s535_s0 = inlined_call_operand.vmem [shape: f32[32,16], index: 0, kind: input, shape index: {}]   ;;  %s536_s4 = inlined_call_operand.vmem [shape: f32[1,32], index: 4, kind: input, shape index: {}]   ;;  %s537_s6 = inlined_call_operand.vmem [shape: f32[1,32], index: 6, kind: input, shape index: {}]   ;;  %s538_s5 = inlined_call_operand.vmem [shape: f32[32,32], index: 5, kind: input, shape index: {}]   ;;  %s539_s8 = inlined_call_operand.vmem [shape: f32[1,16], index: 8, kind: input, shape index: {}]   ;;  %s540_s7 = inlined_call_operand.vmem [shape: f32[32,16], index: 7, kind: input, shape index: {}]   ;;  %s541_s9 = inlined_call_operand.vmem [shape: f32[32,16], index: 9, kind: output, shape index: {}]  }
   0x1   :  { %v43_v0 = vld [vmem:[%s532_s3 + $0x8] sm:$0xff]  ;;  %v42_v2 = vld [vmem:[%s532_s3] sm:$0xff]  ;;  %v40_v8 = vld [vmem:[%s534_s1 + $0x10] sm:$0xff] }
   0x2   :  { %v37_v1 = vld [vmem:[%s533_s2 + $0x8] sm:$0xff]  ;;  %71 = vmatpush.msra.mxu0 %v43_v0  ;;  %v36_v3 = vld [vmem:[%s533_s2] sm:$0xff]  ;;  %v34_v9 = vld [vmem:[%s535_s0 + $0x10] sm:$0xff] }
   0x3   :  { %112 = vmatpush.msra.mxu1 %v37_v1  ;;  %v38_v4 = vld [vmem:[%s534_s1] sm:$0xff]  ;;  %v39_v6 = vld [vmem:[%s534_s1 + $0x8] sm:$0xff]  ;;  %v41_v10 = vld [vmem:[%s534_s1 + $0x18] sm:$0xff] }
   0x4   :  { %v32_v5 = vld [vmem:[%s535_s0] sm:$0xff]  ;;  %72 = vmatpush.msra.mxu0 %v42_v2  ;;  %v33_v7 = vld [vmem:[%s535_s0 + $0x8] sm:$0xff]  ;;  %v35_v11 = vld [vmem:[%s535_s0 + $0x18] sm:$0xff] }
   0x5   :  { %113 = vmatpush.msra.mxu1 %v36_v3  ;;  %326 = vmatmul.msk.f32.vlgmr.msra.gmra.mxu0 %vm44_vm0, %v38_v4  ;;  %v142_v12 = vld [vmem:[%s538_s5 + $0x18] sm:$0xff]  ;;  %v141_v13 = vld [vmem:[%s538_s5 + $0x10] sm:$0xff]  ;;  %v140_v14 = vld [vmem:[%s538_s5 + $0x8] sm:$0xff] }
   0x6   :  { %330 = vmatmul.msk.f32.vlgmr.msra.gmra.mxu1 %vm44_vm0, %v32_v5  ;;  %172 = vmatpush.msra.mxu2 %v142_v12  ;;  %v139_v15 = vld [vmem:[%s538_s5] sm:$0xff]  ;;  %v196_v37 = vld [vmem:[%s540_s7 + $0x18] sm:$0xff]  ;;  %v195_v38 = vld [vmem:[%s540_s7 + $0x10] sm:$0xff] }
   0x7   :  { %v346_v16 = vld [vmem:[%s536_s4] ss:$0 sm:$0xff]  ;;  %225 = vmatpush.msra.mxu3 %v196_v37  ;;  %v194_v39 = vld [vmem:[%s540_s7 + $0x8] sm:$0xff] }
   0x8   :  { %173 = vmatpush.msra.mxu2 %v141_v13  ;;  %v193_v40 = vld [vmem:[%s540_s7] sm:$0xff] }
   0x9   :  { %226 = vmatpush.msra.mxu3 %v195_v38  ;;  %v347_v41 = vld [vmem:[%s537_s6] ss:$0 sm:$0xff] }
   0xa   :  { %174 = vmatpush.msra.mxu2 %v140_v14  ;;  %v348_v54 = vld [vmem:[%s539_s8] ss:$0 sm:$0xff] }
   0xb   :  { %227 = vmatpush.msra.mxu3 %v194_v39 }
   0xc   :  { %175 = vmatpush.msra.mxu2 %v139_v15 }
   0xd   :  { %327 = vmatmul.msk.f32.gmra.mxu0 %vm44_vm0, %v39_v6  ;;  %228 = vmatpush.msra.mxu3 %v193_v40 }
   0xe   :  { %331 = vmatmul.msk.f32.gmra.mxu1 %vm44_vm0, %v33_v7 }
  0x15   :  { %328 = vmatmul.msk.f32.gmra.mxu0 %vm44_vm0, %v40_v8 }
  0x16   :  { %332 = vmatmul.msk.f32.gmra.mxu1 %vm44_vm0, %v34_v9 }
  0x1d   :  { %329 = vmatmul.msk.f32.gmra.mxu0 %vm44_vm0, %v41_v10 }
  0x1e   :  { %333 = vmatmul.msk.f32.gmra.mxu1 %vm44_vm0, %v35_v11 }
  0x82   :  { %v74_v17 = vpop.f32.mrf.mxu0 }
  0x83   :  { %v115_v18 = vpop.f32.mrf.mxu1 }
  0x84   :  { %v116_v19 = vadd.f32 %v115_v18, %v74_v17 }
  0x86   :  { %v131_v20 = vadd.f32 %v346_v16, %v116_v19 }
  0x88   :  { %349 = vtanh.f32 %v131_v20 }
  0x8a   :  { %v77_v21 = vpop.f32.mrf.mxu0 }
  0x8b   :  { %v118_v22 = vpop.f32.mrf.mxu1 }
  0x8c   :  { %v119_v23 = vadd.f32 %v118_v22, %v77_v21 }
  0x8e   :  { %v350_v24 = vpop.eup %349  ;;  %v132_v25 = vadd.f32 %v346_v16, %v119_v23 }
  0x8f   :  { %334 = vmatmul.msk.f32.vlgmr.msra.gmra.mxu2 %vm147_vm1, %v350_v24 }
  0x90   :  { %351 = vtanh.f32 %v132_v25 }
  0x92   :  { %v80_v26 = vpop.f32.mrf.mxu0 }
  0x93   :  { %v121_v27 = vpop.f32.mrf.mxu1 }
  0x94   :  { %v122_v28 = vadd.f32 %v121_v27, %v80_v26 }
  0x96   :  { %v352_v29 = vpop.eup %351  ;;  %v133_v30 = vadd.f32 %v346_v16, %v122_v28 }
  0x97   :  { %335 = vmatmul.msk.f32.gmra.mxu2 %vm147_vm1, %v352_v29 }
  0x98   :  { %353 = vtanh.f32 %v133_v30 }
  0x9a   :  { %v83_v31 = vpop.f32.mrf.mxu0 }
  0x9b   :  { %v124_v32 = vpop.f32.mrf.mxu1 }
  0x9c   :  { %v125_v33 = vadd.f32 %v124_v32, %v83_v31 }
  0x9e   :  { %v354_v34 = vpop.eup %353  ;;  %v134_v35 = vadd.f32 %v346_v16, %v125_v33 }
  0x9f   :  { %336 = vmatmul.msk.f32.gmra.mxu2 %vm147_vm1, %v354_v34 }
  0xa0   :  { %355 = vtanh.f32 %v134_v35 }
  0xa6   :  { %v356_v36 = vpop.eup %355 }
  0xa7   :  { %337 = vmatmul.msk.f32.gmra.mxu2 %vm147_vm1, %v356_v36 }
 0x112   :  { %v177_v42 = vpop.f32.mrf.mxu2 }
 0x113   :  { %v178_v43 = vadd.f32 %v347_v41, %v177_v42 }
 0x115   :  { %357 = vtanh.f32 %v178_v43 }
 0x11a   :  { %v180_v44 = vpop.f32.mrf.mxu2 }
 0x11b   :  { %v358_v45 = vpop.eup %357  ;;  %v181_v46 = vadd.f32 %v347_v41, %v180_v44 }
 0x11c   :  { %338 = vmatmul.msk.f32.vlgmr.msra.gmra.mxu3 %vm147_vm1, %v358_v45 }
 0x11d   :  { %359 = vtanh.f32 %v181_v46 }
 0x122   :  { %v183_v47 = vpop.f32.mrf.mxu2 }
 0x123   :  { %v360_v48 = vpop.eup %359  ;;  %v184_v49 = vadd.f32 %v347_v41, %v183_v47 }
 0x124   :  { %339 = vmatmul.msk.f32.gmra.mxu3 %vm147_vm1, %v360_v48 }
 0x125   :  { %361 = vtanh.f32 %v184_v49 }
 0x12a   :  { %v186_v50 = vpop.f32.mrf.mxu2 }
 0x12b   :  { %v362_v51 = vpop.eup %361  ;;  %v187_v52 = vadd.f32 %v347_v41, %v186_v50 }
 0x12c   :  { %340 = vmatmul.msk.f32.gmra.mxu3 %vm147_vm1, %v362_v51 }
 0x12d   :  { %363 = vtanh.f32 %v187_v52 }
 0x133   :  { %v364_v53 = vpop.eup %363 }
 0x134   :  { %341 = vmatmul.msk.f32.gmra.mxu3 %vm147_vm1, %v364_v53 }
 0x19f   :  { %v230_v55 = vpop.f32.mrf.mxu3 }
 0x1a0   :  { %v231_v56 = vadd.f32 %v348_v54, %v230_v55 }
 0x1a2   :  { %v342_v57 = vmul.f32 -1.442695, %v231_v56 }
 0x1a4   :  { %365 = vpow2.f32 %v342_v57 }
 0x1a7   :  { %v233_v58 = vpop.f32.mrf.mxu3 }
 0x1a8   :  { %v234_v59 = vadd.f32 %v348_v54, %v233_v58 }
 0x1aa   :  { %v366_v60 = vpop.eup %365  ;;  %v343_v61 = vmul.f32 -1.442695, %v234_v59 }
 0x1ab   :  { %v254_v62 = vadd.f32 1.0, %v366_v60 }
 0x1ac   :  { %367 = vpow2.f32 %v343_v61 }
 0x1ad   :  { %369 = vrcp.f32 %v254_v62  ;;  %v269_v7 = vand.u32 2147483648, %v254_v62  ;;  %v267_v10 = vand.u32 2147483647, %v254_v62  ;;  %vm263_vm3 = vweird.f32 %v254_v62 }
 0x1af   :  { %v236_v63 = vpop.f32.mrf.mxu3  ;;  %v270_v16 = vor.u32 1.1754944e-38, %v269_v7  ;;  %vm268_vm5 = vcmp.eq.f32.partialorder %v267_v10, 8.507059e+37 }
 0x1b0   :  { %v237_v0 = vadd.f32 %v348_v54, %v236_v63 }
 0x1b2   :  { %v368_v1 = vpop.eup %367  ;;  %v344_v2 = vmul.f32 -1.442695, %v237_v0 }
 0x1b3   :  { %v370_v3 = vpop.eup %369  ;;  %v255_v4 = vadd.f32 1.0, %v368_v1 }
 0x1b4   :  { %v259_v5 = vmul.f32 %v370_v3, %v254_v62  ;;  %371 = vpow2.f32 %v344_v2  ;;  %vm264_vm2 = vweird.f32 %v370_v3 }
 0x1b5   :  { %373 = vrcp.f32 %v255_v4  ;;  %vm265_vm4 = vmor %vm263_vm3, %vm264_vm2  ;;  %v284_v22 = vand.u32 2147483648, %v255_v4  ;;  %v282_v24 = vand.u32 2147483647, %v255_v4  ;;  %vm278_vm7 = vweird.f32 %v255_v4 }
 0x1b6   :  { %v260_v6 = vsub.f32 1.0, %v259_v5 }
 0x1b7   :  { %v239_v8 = vpop.f32.mrf.mxu3  ;;  %v285_v28 = vor.u32 1.1754944e-38, %v284_v22  ;;  %vm283_vm9 = vcmp.eq.f32.partialorder %v282_v24, 8.507059e+37 }
 0x1b8   :  { %v261_v9 = vmul.f32 %v370_v3, %v260_v6  ;;  %v240_v11 = vadd.f32 %v348_v54, %v239_v8 }
 0x1ba   :  { %v372_v12 = vpop.eup %371  ;;  %v262_v13 = vadd.f32 %v370_v3, %v261_v9  ;;  %v345_v14 = vmul.f32 -1.442695, %v240_v11 }
 0x1bb   :  { %v374_v15 = vpop.eup %373  ;;  %v256_v17 = vadd.f32 1.0, %v372_v12 }
 0x1bc   :  { %v266_v18 = vsel %vm265_vm4, %v370_v3, %v262_v13  ;;  %v274_v19 = vmul.f32 %v374_v15, %v255_v4  ;;  %375 = vpow2.f32 %v345_v14  ;;  %vm279_vm6 = vweird.f32 %v374_v15 }
 0x1bd   :  { %v271_v20 = vsel %vm268_vm5, %v270_v16, %v266_v18  ;;  %377 = vrcp.f32 %v256_v17  ;;  %vm280_vm8 = vmor %vm278_vm7, %vm279_vm6  ;;  %v299_v34 = vand.u32 2147483648, %v256_v17  ;;  %v297_v36 = vand.u32 2147483647, %v256_v17 }
 0x1be   :  { %318 = vst.msk [vmem:[%s541_s9] sm:$0xff] %vm44_vm0, %v271_v20  ;;  %v275_v21 = vsub.f32 1.0, %v274_v19  ;;  %vm293_vm11 = vweird.f32 %v256_v17 }
 0x1bf   :  { %v300_v39 = vor.u32 1.1754944e-38, %v299_v34  ;;  %vm298_vm13 = vcmp.eq.f32.partialorder %v297_v36, 8.507059e+37 }
 0x1c0   :  { %v276_v23 = vmul.f32 %v374_v15, %v275_v21 }
 0x1c2   :  { %v376_v25 = vpop.eup %375  ;;  %v277_v26 = vadd.f32 %v374_v15, %v276_v23 }
 0x1c3   :  { %v378_v27 = vpop.eup %377  ;;  %v257_v29 = vadd.f32 1.0, %v376_v25 }
 0x1c4   :  { %v281_v30 = vsel %vm280_vm8, %v374_v15, %v277_v26  ;;  %v289_v31 = vmul.f32 %v378_v27, %v256_v17  ;;  %vm294_vm10 = vweird.f32 %v378_v27 }
 0x1c5   :  { %v286_v32 = vsel %vm283_vm9, %v285_v28, %v281_v30  ;;  %379 = vrcp.f32 %v257_v29  ;;  %vm295_vm12 = vmor %vm293_vm11, %vm294_vm10  ;;  %v314_v44 = vand.u32 2147483648, %v257_v29  ;;  %v312_v46 = vand.u32 2147483647, %v257_v29 }
 0x1c6   :  { %319 = vst.msk [vmem:[%s541_s9 + $0x8] sm:$0xff] %vm44_vm0, %v286_v32  ;;  %v290_v33 = vsub.f32 1.0, %v289_v31  ;;  %vm308_vm15 = vweird.f32 %v257_v29 }
 0x1c7   :  { %v315_v48 = vor.u32 1.1754944e-38, %v314_v44  ;;  %vm313_vm2 = vcmp.eq.f32.partialorder %v312_v46, 8.507059e+37 }
 0x1c8   :  { %v291_v35 = vmul.f32 %v378_v27, %v290_v33 }
 0x1ca   :  { %v292_v37 = vadd.f32 %v378_v27, %v291_v35 }
 0x1cb   :  { %v380_v38 = vpop.eup %379 }
 0x1cc   :  { %v296_v40 = vsel %vm295_vm12, %v378_v27, %v292_v37  ;;  %v304_v41 = vmul.f32 %v380_v38, %v257_v29  ;;  %vm309_vm14 = vweird.f32 %v380_v38 }
 0x1cd   :  { %v301_v42 = vsel %vm298_vm13, %v300_v39, %v296_v40  ;;  %vm310_vm1 = vmor %vm308_vm15, %vm309_vm14 }
 0x1ce   :  { %320 = vst.msk [vmem:[%s541_s9 + $0x10] sm:$0xff] %vm44_vm0, %v301_v42  ;;  %v305_v43 = vsub.f32 1.0, %v304_v41 }
 0x1d0   :  { %v306_v45 = vmul.f32 %v380_v38, %v305_v43 }
 0x1d2   :  { %v307_v47 = vadd.f32 %v380_v38, %v306_v45 }
 0x1d4   :  { %v311_v49 = vsel %vm310_vm1, %v380_v38, %v307_v47 }
 0x1d5   :  { %v316_v50 = vsel %vm313_vm2, %v315_v48, %v311_v49 }
 0x1d6   :  { %321 = vst.msk [vmem:[%s541_s9 + $0x18] sm:$0xff] %vm44_vm0, %v316_v50 }

</bundles_post_ra>
